<compile_context>
chip_gen: v7x
topology: tpu7x:2x2x1
jax: 0.10.0
libtpu: 0.0.40
codegen_flags: <defaults>
</compile_context>

<pallas_src>
import functools
from typing import NamedTuple

import jax
import jax.numpy as jnp
from jax.experimental import pallas as pl
from jax.experimental.pallas import tpu as pltpu


def _round_up(x, m):
    return ((x + m - 1) // m) * m


def _model_temp_kernel(inv_t_ref, x_ref, w_ref, b_ref, o_ref):
    # inv_t_ref: (1,) f32 scalar-prefetch (SMEM) -- 1 / temperature
    # x_ref:     (tm, tk) bf16 VMEM tile of activations
    # w_ref:     (tk, tn) bf16 VMEM tile of weights
    # b_ref:     (1, tn)  f32 VMEM tile of bias
    # o_ref:     (tm, tn) f32 VMEM output tile; doubles as the accumulator
    #            (block index constant across k -> resident for the K loop).
    k = pl.program_id(2)

    @pl.when(k == 0)
    def _init():
        o_ref[...] = jnp.zeros_like(o_ref)

    # Pure MXU accumulate on the inner (K) axis; epilogue math deferred.
    o_ref[...] += jnp.dot(
        x_ref[...], w_ref[...], preferred_element_type=jnp.float32
    )

    @pl.when(k == pl.num_programs(2) - 1)
    def _finalize():
        # bias broadcast over tm rows, then temperature scale (× 1/T).
        o_ref[...] = (o_ref[...] + b_ref[...]) * inv_t_ref[0]


class PreparedModel(NamedTuple):
    w: jax.Array    # (h_p, c_p) bf16 weights, cast/padded once
    b: jax.Array    # (1, c_p)  f32 bias, padded once
    h: int          # original hidden dim
    c: int          # original number of classes
    tk: int         # K tile (multiple of 128, or == h when h fits in one tile)
    tn: int         # N tile (multiple of 128, or == c when c fits in one tile)


def prepare_model(w, b, *, tn=512, tk=1024):
    """Cast/pad the fixed synthetic-model parameters exactly once.

    A block equal to the full (untiled) dim is exempt from the (8, 128)
    divisibility rule, so dims that fit inside one tile need no padding.
    """
    h, c = w.shape
    assert b.shape == (1, c)
    if h <= tk:
        tk, h_p = h, h                   # single K block, no K padding
    else:
        h_p = _round_up(h, tk)           # tk stays a multiple of 128
    if c <= tn:
        tn, c_p = c, c                   # single N block, no C padding
    else:
        c_p = _round_up(c, tn)           # tn stays a multiple of 128
    if (h_p, c_p) != (h, c):
        w = jnp.pad(w, ((0, h_p - h), (0, c_p - c)))
        b = jnp.pad(b, ((0, 0), (0, c_p - c)))
    return PreparedModel(
        w=w.astype(jnp.bfloat16),
        b=b.astype(jnp.float32),
        h=h, c=c, tk=tk, tn=tn,
    )


@functools.partial(jax.jit, static_argnames=("n", "c", "tm", "tn", "tk"))
def _forward(inv_t, x, w_p, b_p, *, n, c, tm, tn, tk):
    h = x.shape[1]
    h_p, c_p = w_p.shape
    n_p = _round_up(n, tm)

    # Per-call prep touches x only: cast to bf16 if not already, zero-pad rows
    # / K only when a tile does not already divide the dim.
    if x.dtype != jnp.bfloat16:
        x = x.astype(jnp.bfloat16)
    if (n_p, h_p) != (n, h):
        x = jnp.pad(x, ((0, n_p - n), (0, h_p - h)))

    grid = (n_p // tm, c_p // tn, h_p // tk)
    n_i, n_j, _ = grid

    out = pl.pallas_call(
        _model_temp_kernel,
        out_shape=jax.ShapeDtypeStruct((n_p, c_p), jnp.float32),
        grid_spec=pltpu.PrefetchScalarGridSpec(
            num_scalar_prefetch=1,   # 1/T scalar -> SMEM
            grid=grid,
            in_specs=[
                pl.BlockSpec((tm, tk), lambda i, j, k, s: (i, k)),  # x
                pl.BlockSpec((tk, tn), lambda i, j, k, s: (k, j)),  # W
                pl.BlockSpec((1, tn), lambda i, j, k, s: (0, j)),   # bias
            ],
            out_specs=pl.BlockSpec((tm, tn), lambda i, j, k, s: (i, j)),
        ),
        compiler_params=pltpu.CompilerParams(
            dimension_semantics=("parallel", "parallel", "arbitrary"),
            vmem_limit_bytes=32 * 1024 * 1024,
        ),
        cost_estimate=pl.CostEstimate(
            flops=2 * n_p * h_p * c_p,
            transcendentals=0,
            # x is re-streamed once per output-column tile, W once per
            # output-row tile; output written once.
            bytes_accessed=(n_j * n_p * h_p * 2
                            + n_i * h_p * c_p * 2
                            + n_i * c_p * 4
                            + n_p * c_p * 4),
        ),
    )(inv_t, x, w_p, b_p)

    if (n_p, c_p) != (n, c):
        out = out[:n, :c]
    return out


def model_with_temperature(x, model: PreparedModel, temperature=1.0, *, tm=512):
    """ModelWithTemperature.forward: logits = synthetic_model(x); logits / T."""
    n, h = x.shape
    assert h == model.h, "input hidden dim mismatch"
    assert temperature != 0.0, "temperature must be non-zero"
    # Host-side reciprocal: one divide total, epilogue multiplies by 1/T.
    inv_t = jnp.asarray([1.0 / float(temperature)], dtype=jnp.float32)
    tm = n if n <= tm else tm   # collapse the M grid for small batches
    return _forward(inv_t, x, model.w, model.b,
                    n=n, c=model.c, tm=tm, tn=model.tn, tk=model.tk)


if __name__ == "__main__":
    # Small demo shapes for the synthetic linear "model":
    # batch=64, hidden=256, classes=256.  With default tiles the whole problem
    # fits in a single grid step; a second run with forced small tiles
    # exercises the multi-step (i, j, k) grid and the K-loop accumulation.
    N, H, C = 64, 256, 256
    key = jax.random.PRNGKey(0)
    kx, kw, kb = jax.random.split(key, 3)

    x = jax.random.normal(kx, (N, H), dtype=jnp.float32)
    # Deterministic synthetic "model" parameters (no checkpoint load).
    w = jax.random.normal(kw, (H, C), dtype=jnp.float32) * 0.1
    b = jax.random.normal(kb, (1, C), dtype=jnp.float32) * 0.01

    temperature = 1.5   # any non-zero T; __init__ default is 1.0

    # Fixed parameters are cast/padded exactly once, outside the hot path.
    model = prepare_model(w, b)

    out = model_with_temperature(x, model, temperature)
    out = jax.block_until_ready(out)

    # Reference in plain JAX with the same bf16-operand / f32-accumulate path.
    ref = (
        jnp.dot(
            x.astype(jnp.bfloat16),
            w.astype(jnp.bfloat16),
            preferred_element_type=jnp.float32,
        )
        + b
    ) / temperature

    assert out.shape == (N, C)
    assert jnp.allclose(out, ref, atol=2e-3, rtol=2e-3), "mismatch vs reference"

    # Multi-step grid check: tm=32, tn=128, tk=128 -> grid (2, 2, 2).
    model_small = prepare_model(w, b, tn=128, tk=128)
    out2 = model_with_temperature(x, model_small, temperature, tm=32)
    out2 = jax.block_until_ready(out2)
    assert jnp.allclose(out2, ref, atol=2e-3, rtol=2e-3), "mismatch (tiled)"

    # TODO(synk): set_temperature / ECELoss are host-side calibration utilities
    # (grid search over T + data-dependent boolean-mask bin reductions); they
    # are not part of the forward pass and are not implemented as kernels.
    print("KERNEL_OK")
</pallas_src>

<mosaic_0001>
module attributes {stable_mosaic.version = 11 : i64} {
  func.func @_model_temp_kernel(%arg0: i32, %arg1: i32, %arg2: i32, %arg3: memref<1xf32, #tpu.memory_space<smem>>, %arg4: memref<64x256xbf16, #tpu.memory_space<vmem>>, %arg5: memref<256x256xbf16, #tpu.memory_space<vmem>>, %arg6: memref<1x256xf32, #tpu.memory_space<vmem>>, %arg7: memref<64x256xf32, #tpu.memory_space<vmem>>) attributes {dimension_semantics = [#tpu.dimension_semantics<parallel>, #tpu.dimension_semantics<parallel>, #tpu.dimension_semantics<arbitrary>], iteration_bounds = array<i64: 1, 1, 1>, scalar_prefetch = 1 : i64, scratch_operands = 0 : i64, tpu.core_type = #tpu.core_type<tc>, window_params = [{transform_indices = @transform_0, window_bounds = array<i64: 64, 256>}, {transform_indices = @transform_1, window_bounds = array<i64: 256, 256>}, {transform_indices = @transform_2, window_bounds = array<i64: 1, 256>}, {transform_indices = @transform_3, window_bounds = array<i64: 64, 256>}]} {
    %c0_i32 = arith.constant 0 : i32
    %0 = arith.cmpi eq, %arg2, %c0_i32 : i32
    %1 = arith.extui %0 : i1 to i32
    %c0_i32_0 = arith.constant 0 : i32
    %2 = arith.cmpi ne, %1, %c0_i32_0 : i32
    scf.if %2 {
      %cst_10 = arith.constant 0.000000e+00 : f32
      %12 = vector.broadcast %cst_10 : f32 to vector<64x256xf32>
      %c0_11 = arith.constant 0 : index
      %c0_12 = arith.constant 0 : index
      %13 = vector.load %arg7[%c0_11, %c0_12] : memref<64x256xf32, #tpu.memory_space<vmem>>, vector<64x256xf32>
      tpu.vector_store %arg7[%c0_11, %c0_12], %12 {strides = array<i32>} : memref<64x256xf32, #tpu.memory_space<vmem>>, vector<64x256xf32>,
    } else {
    }
    %c0 = arith.constant 0 : index
    %c0_1 = arith.constant 0 : index
    %3 = vector.load %arg7[%c0, %c0_1] : memref<64x256xf32, #tpu.memory_space<vmem>>, vector<64x256xf32>
    %c0_2 = arith.constant 0 : index
    %c0_3 = arith.constant 0 : index
    %4 = vector.load %arg4[%c0_2, %c0_3] : memref<64x256xbf16, #tpu.memory_space<vmem>>, vector<64x256xbf16>
    %c0_4 = arith.constant 0 : index
    %c0_5 = arith.constant 0 : index
    %5 = vector.load %arg5[%c0_4, %c0_5] : memref<256x256xbf16, #tpu.memory_space<vmem>>, vector<256x256xbf16>
    %cst = arith.constant dense<0.000000e+00> : vector<64x256xf32>
    %6 = tpu.matmul %4, %5, %cst {dimension_numbers = #tpu.dot_dimension_numbers<[1], [0], [0], [1], [0, 0, 1, 1], [], []>} : vector<64x256xbf16>, vector<256x256xbf16>, vector<64x256xf32> -> vector<64x256xf32>
    %7 = arith.addf %3, %6 : vector<64x256xf32>
    %c0_6 = arith.constant 0 : index
    %c0_7 = arith.constant 0 : index
    %8 = vector.load %arg7[%c0_6, %c0_7] : memref<64x256xf32, #tpu.memory_space<vmem>>, vector<64x256xf32>
    tpu.vector_store %arg7[%c0_6, %c0_7], %7 {strides = array<i32>} : memref<64x256xf32, #tpu.memory_space<vmem>>, vector<64x256xf32>,
    %c0_i32_8 = arith.constant 0 : i32
    %9 = arith.cmpi eq, %arg2, %c0_i32_8 : i32
    %10 = arith.extui %9 : i1 to i32
    %c0_i32_9 = arith.constant 0 : i32
    %11 = arith.cmpi ne, %10, %c0_i32_9 : i32
    scf.if %11 {
      %c0_10 = arith.constant 0 : index
      %c0_11 = arith.constant 0 : index
      %12 = vector.load %arg7[%c0_10, %c0_11] : memref<64x256xf32, #tpu.memory_space<vmem>>, vector<64x256xf32>
      %c0_12 = arith.constant 0 : index
      %c0_13 = arith.constant 0 : index
      %13 = vector.load %arg6[%c0_12, %c0_13] : memref<1x256xf32, #tpu.memory_space<vmem>>, vector<1x256xf32>
      %14 = vector.broadcast %13 : vector<1x256xf32> to vector<64x256xf32>
      %15 = arith.addf %12, %14 : vector<64x256xf32>
      %c0_14 = arith.constant 0 : index
      %16 = memref.load %arg3[%c0_14] : memref<1xf32, #tpu.memory_space<smem>>
      %17 = vector.broadcast %16 : f32 to vector<64x256xf32>
      %18 = arith.mulf %15, %17 : vector<64x256xf32>
      %c0_15 = arith.constant 0 : index
      %c0_16 = arith.constant 0 : index
      %19 = vector.load %arg7[%c0_15, %c0_16] : memref<64x256xf32, #tpu.memory_space<vmem>>, vector<64x256xf32>
      tpu.vector_store %arg7[%c0_15, %c0_16], %18 {strides = array<i32>} : memref<64x256xf32, #tpu.memory_space<vmem>>, vector<64x256xf32>,
    } else {
    }
    return
  }
  func.func @transform_0(%arg0: i32, %arg1: i32, %arg2: i32, %arg3: memref<1xf32, #tpu.memory_space<smem>>) -> (i32, i32) {
    %c0_i32 = arith.constant 0 : i32
    return %arg0, %arg2 : i32, i32
  }
  func.func @transform_1(%arg0: i32, %arg1: i32, %arg2: i32, %arg3: memref<1xf32, #tpu.memory_space<smem>>) -> (i32, i32) {
    %c0_i32 = arith.constant 0 : i32
    return %arg2, %arg1 : i32, i32
  }
  func.func @transform_2(%arg0: i32, %arg1: i32, %arg2: i32, %arg3: memref<1xf32, #tpu.memory_space<smem>>) -> (i32, i32) {
    %c0_i32 = arith.constant 0 : i32
    %c0_i32_0 = arith.constant 0 : i32
    return %c0_i32, %arg1 : i32, i32
  }
  func.func @transform_3(%arg0: i32, %arg1: i32, %arg2: i32, %arg3: memref<1xf32, #tpu.memory_space<smem>>) -> (i32, i32) {
    %c0_i32 = arith.constant 0 : i32
    return %arg0, %arg1 : i32, i32
  }
}

</mosaic_0001>

<bundles_post_ra>
// kernel: _forward.1
= control target key start
LH: loop header
LB: loop body
LE: loop exit
PB: predicated region body
PF: predicated region fallthrough
CT: control target
= control target key end

     0   :  { %10 = vsyncpa [#allocation5], 0  ;;  %s782_s0 = inlined_call_operand.<no memory space> [shape: f32[1], index: 0, kind: input, shape index: {}]   ;;  %s783_s1 = inlined_call_operand.vmem [shape: bf16[64,256], index: 1, kind: input, shape index: {}]   ;;  %s784_s2 = inlined_call_operand.hbm [shape: bf16[256,256], index: 2, kind: input, shape index: {}]   ;;  %s785_s3 = inlined_call_operand.vmem [shape: f32[1,256], index: 3, kind: input, shape index: {}]   ;;  %s786_s4 = inlined_call_operand.hbm [shape: f32[64,256], index: 4, kind: output, shape index: {}]  }
   0x1   :  { %11 = vsyncpa [#allocation6], 0  ;;  %s697_s15 = smov [#allocation4]   ;;  %s649_s19 = scalar_lea.hbm %s784_s2, 4096 }
   0x2   :  { %s19_s16 = sshll.u32 %s697_s15, 4  ;;  %p650_p0 = scmp.ne.s32.totalorder %s784_s2, %s649_s19  ;;  %s20_s16 = int_to_ptr.vmem [resolvable:$true] %s19_s16 }
   0x3   :  { %p653_p1 = scmp.lt.u32.totalorder %s649_s19, %s784_s2 }
   0x5   :  { %p655_p2 = pnand %p653_p1, %p650_p0 }
   0x7   :  { %658 = shalt.err (!%p655_p2)
}
   0x8   :  { %s659_s24 = scalar_lea.vmem %s20_s16, 4096  ;;  %p664_p4 = scmp.lt.s32.totalorder %s20_s16, %s20_s16 }
   0x9   :  { %p660_p3 = scmp.ne.s32.totalorder %s20_s16, %s659_s24  ;;  %p665_p5 = scmp.lt.s32.totalorder %s659_s24, %s659_s24 }
   0xb   :  { %p666_p6 = por %p665_p5, %p664_p4 }
   0xd   :  { %p667_p7 = pnand %p666_p6, %p660_p3 }
   0xf   :  { %670 = shalt.err (!%p667_p7)
}
  0x10   :  { %s698_s25 = smov 128   ;;  %s699_s26 = smov 8  }
  0x11   :  { %25 = dma.hbm_to_vmem [thread:$0]  %s784_s2, 4096, %s20_s16, [#allocation5], %s698_s25, %s698_s25, %s699_s26  }
  0x12   :  { %693 = dma.done.wait [#allocation5], 4096  }
  0x13   :  { %694 = vsyncadd [#allocation5], 4294963200  ;;  %v589_v0 = vld [vmem:[#allocation4 + $0x4] ss:$8 sps:$4 sm:$0xff]   ;;  %v591_v1 = vld [vmem:[#allocation4] ss:$8 sps:$4 sm:$0xff]   ;;  %v433_v40 = vlaneseq  ;;  %v460_v51 = vstv %s782_s0 }
  0x14   :  { %307 = vmatprep.subr.bf16.mxu0 %v589_v0  ;;  %550 = vmatprep.subr.bf16.mxu1 %v589_v0  ;;  %v592_v2 = vld [vmem:[#allocation4 + $0x14] ss:$8 sps:$4 sm:$0xff]   ;;  %v594_v3 = vld [vmem:[#allocation4 + $0x10] ss:$8 sps:$4 sm:$0xff]   ;;  %v595_v4 = vld [vmem:[#allocation4 + $0x24] ss:$8 sps:$4 sm:$0xff]  }
  0x15   :  { %308 = vmatpush1.bf16.msra.mxu0 %v591_v1  ;;  %566 = vmatpush1.bf16.msra.mxu1 %v591_v1  ;;  %v597_v5 = vld [vmem:[#allocation4 + $0x20] ss:$8 sps:$4 sm:$0xff]   ;;  %v598_v6 = vld [vmem:[#allocation4 + $0x34] ss:$8 sps:$4 sm:$0xff]   ;;  %v600_v7 = vld [vmem:[#allocation4 + $0x30] ss:$8 sps:$4 sm:$0xff]  }
  0x16   :  { %309 = vmatprep.subr.bf16.mxu0 %v592_v2  ;;  %551 = vmatprep.subr.bf16.mxu1 %v592_v2  ;;  %v601_v8 = vld [vmem:[#allocation4 + $0x44] ss:$8 sps:$4 sm:$0xff]   ;;  %v603_v9 = vld [vmem:[#allocation4 + $0x40] ss:$8 sps:$4 sm:$0xff]   ;;  %v604_v10 = vld [vmem:[#allocation4 + $0x54] ss:$8 sps:$4 sm:$0xff]  }
  0x17   :  { %v606_v11 = vld [vmem:[#allocation4 + $0x50] ss:$8 sps:$4 sm:$0xff]   ;;  %v607_v12 = vld [vmem:[#allocation4 + $0x64] ss:$8 sps:$4 sm:$0xff]   ;;  %v609_v14 = vld [vmem:[#allocation4 + $0x60] ss:$8 sps:$4 sm:$0xff]  }
  0x18   :  { %v639_v13 = vld [vmem:[%s783_s1 + $0x4] ss:$8 sps:$4 sm:$0xff]   ;;  %v610_v16 = vld [vmem:[#allocation4 + $0x74] ss:$8 sps:$4 sm:$0xff]   ;;  %v612_v17 = vld [vmem:[#allocation4 + $0x70] ss:$8 sps:$4 sm:$0xff]  }
  0x19   :  { %310 = vmatpush1.bf16.msra.mxu0 %v594_v3  ;;  %567 = vmatpush1.bf16.msra.mxu1 %v594_v3  ;;  %v642_v15 = vld [vmem:[%s783_s1 + $0x24] ss:$8 sps:$4 sm:$0xff]   ;;  %v615_v19 = vld [vmem:[#allocation4 + $0x80] ss:$8 sps:$4 sm:$0xff]   ;;  %v616_v20 = vld [vmem:[#allocation4 + $0x94] ss:$8 sps:$4 sm:$0xff]  }
  0x1a   :  { %311 = vmatprep.subr.bf16.mxu0 %v595_v4  ;;  %552 = vmatprep.subr.bf16.mxu1 %v595_v4  ;;  %v613_v18 = vld [vmem:[#allocation4 + $0x84] ss:$8 sps:$4 sm:$0xff]   ;;  %v618_v21 = vld [vmem:[#allocation4 + $0x90] ss:$8 sps:$4 sm:$0xff]   ;;  %v621_v23 = vld [vmem:[#allocation4 + $0xa0] ss:$8 sps:$4 sm:$0xff]  }
  0x1b   :  { %339 = vmatprep.mubr.bf16.mxu0 %v639_v13  ;;  %359 = vmatprep.mubr.bf16.mxu1 %v642_v15  ;;  %v619_v22 = vld [vmem:[#allocation4 + $0xa4] ss:$8 sps:$4 sm:$0xff]   ;;  %v622_v24 = vld [vmem:[#allocation4 + $0xb4] ss:$8 sps:$4 sm:$0xff]   ;;  %v624_v25 = vld [vmem:[#allocation4 + $0xb0] ss:$8 sps:$4 sm:$0xff]  }
  0x1c   :  { %v625_v26 = vld [vmem:[#allocation4 + $0xc4] ss:$8 sps:$4 sm:$0xff]   ;;  %v627_v27 = vld [vmem:[#allocation4 + $0xc0] ss:$8 sps:$4 sm:$0xff]   ;;  %v628_v28 = vld [vmem:[#allocation4 + $0xd4] ss:$8 sps:$4 sm:$0xff]  }
  0x1d   :  { %312 = vmatpush1.bf16.msra.mxu0 %v597_v5  ;;  %568 = vmatpush1.bf16.msra.mxu1 %v597_v5  ;;  %v630_v29 = vld [vmem:[#allocation4 + $0xd0] ss:$8 sps:$4 sm:$0xff]   ;;  %v631_v30 = vld [vmem:[#allocation4 + $0xe4] ss:$8 sps:$4 sm:$0xff]   ;;  %v633_v31 = vld [vmem:[#allocation4 + $0xe0] ss:$8 sps:$4 sm:$0xff]  }
  0x1e   :  { %313 = vmatprep.subr.bf16.mxu0 %v598_v6  ;;  %553 = vmatprep.subr.bf16.mxu1 %v598_v6  ;;  %v634_v32 = vld [vmem:[#allocation4 + $0xf4] ss:$8 sps:$4 sm:$0xff]   ;;  %v636_v33 = vld [vmem:[#allocation4 + $0xf0] ss:$8 sps:$4 sm:$0xff]   ;;  %v637_v34 = vld [vmem:[%s783_s1] ss:$8 sps:$4 sm:$0xff]  }
  0x1f   :  { %v640_v35 = vld [vmem:[%s783_s1 + $0x20] ss:$8 sps:$4 sm:$0xff]   ;;  %v643_v36 = vld [vmem:[%s783_s1 + $0x14] ss:$8 sps:$4 sm:$0xff]   ;;  %v647_v38 = vld [vmem:[%s783_s1 + $0x10] ss:$8 sps:$4 sm:$0xff]  }
  0x20   :  { %v645_v37 = vld [vmem:[%s783_s1 + $0x34] ss:$8 sps:$4 sm:$0xff]   ;;  %v648_v39 = vld [vmem:[%s783_s1 + $0x30] ss:$8 sps:$4 sm:$0xff]   ;;  %v434_v41 = vshrl.u32 %v433_v40, 7  ;;  %s700_s0 = smov [#allocation7]  }
  0x21   :  { %314 = vmatpush1.bf16.msra.mxu0 %v600_v7  ;;  %569 = vmatpush1.bf16.msra.mxu1 %v600_v7  ;;  %v431_v43 = vld [vmem:[%s785_s3] sm:$0x3]  ;;  %s498_s1 = sshll.u32 %s700_s0, 4  ;;  %s499_s1 = int_to_ptr.vmem [resolvable:$true] %s498_s1 }
  0x22   :  { %315 = vmatprep.subr.bf16.mxu0 %v601_v8  ;;  %554 = vmatprep.subr.bf16.mxu1 %v601_v8  ;;  %v435_v42 = vsub.s32 0, %v434_v41  ;;  %v439_v44 = vsub.s32 1, %v434_v41  ;;  %s671_s3 = scalar_lea.vmem %s499_s1, 2048  ;;  %p676_p9 = scmp.lt.s32.totalorder %s499_s1, %s499_s1 }
  0x23   :  { %p672_p8 = scmp.ne.s32.totalorder %s499_s1, %s671_s3  ;;  %p677_p10 = scmp.lt.s32.totalorder %s671_s3, %s671_s3 }
  0x24   :  { %v436_v45 = vrot.slane %v431_v43, %v435_v42  ;;  %v440_v48 = vrot.slane %v431_v43, %v439_v44 }
  0x25   :  { %316 = vmatpush1.bf16.msra.mxu0 %v603_v9  ;;  %570 = vmatpush1.bf16.msra.mxu1 %v603_v9  ;;  %p678_p11 = por %p677_p10, %p676_p9 }
  0x26   :  { %317 = vmatprep.subr.bf16.mxu0 %v604_v10  ;;  %555 = vmatprep.subr.bf16.mxu1 %v604_v10 }
  0x27   :  { %p679_p12 = pnand %p678_p11, %p672_p8 }
  0x29   :  { %318 = vmatpush1.bf16.msra.mxu0 %v606_v11  ;;  %571 = vmatpush1.bf16.msra.mxu1 %v606_v11 }
  0x2a   :  { %319 = vmatprep.subr.bf16.mxu0 %v607_v12  ;;  %556 = vmatprep.subr.bf16.mxu1 %v607_v12 }
  0x2d   :  { %320 = vmatpush1.bf16.msra.mxu0 %v609_v14  ;;  %572 = vmatpush1.bf16.msra.mxu1 %v609_v14 }
  0x2e   :  { %321 = vmatprep.subr.bf16.mxu0 %v610_v16  ;;  %557 = vmatprep.subr.bf16.mxu1 %v610_v16 }
  0x31   :  { %322 = vmatpush1.bf16.msra.mxu0 %v612_v17  ;;  %573 = vmatpush1.bf16.msra.mxu1 %v612_v17 }
  0x32   :  { %323 = vmatprep.subr.bf16.mxu0 %v613_v18  ;;  %558 = vmatprep.subr.bf16.mxu1 %v613_v18 }
  0x35   :  { %324 = vmatpush1.bf16.msra.mxu0 %v615_v19  ;;  %574 = vmatpush1.bf16.msra.mxu1 %v615_v19 }
  0x36   :  { %325 = vmatprep.subr.bf16.mxu0 %v616_v20  ;;  %559 = vmatprep.subr.bf16.mxu1 %v616_v20 }
  0x39   :  { %326 = vmatpush1.bf16.msra.mxu0 %v618_v21  ;;  %575 = vmatpush1.bf16.msra.mxu1 %v618_v21 }
  0x3a   :  { %327 = vmatprep.subr.bf16.mxu0 %v619_v22  ;;  %560 = vmatprep.subr.bf16.mxu1 %v619_v22 }
  0x3d   :  { %328 = vmatpush1.bf16.msra.mxu0 %v621_v23  ;;  %576 = vmatpush1.bf16.msra.mxu1 %v621_v23 }
  0x3e   :  { %329 = vmatprep.subr.bf16.mxu0 %v622_v24  ;;  %561 = vmatprep.subr.bf16.mxu1 %v622_v24 }
  0x41   :  { %330 = vmatpush1.bf16.msra.mxu0 %v624_v25  ;;  %577 = vmatpush1.bf16.msra.mxu1 %v624_v25 }
  0x42   :  { %331 = vmatprep.subr.bf16.mxu0 %v625_v26  ;;  %562 = vmatprep.subr.bf16.mxu1 %v625_v26 }
  0x45   :  { %332 = vmatpush1.bf16.msra.mxu0 %v627_v27  ;;  %578 = vmatpush1.bf16.msra.mxu1 %v627_v27 }
  0x46   :  { %333 = vmatprep.subr.bf16.mxu0 %v628_v28  ;;  %563 = vmatprep.subr.bf16.mxu1 %v628_v28 }
  0x49   :  { %334 = vmatpush1.bf16.msra.mxu0 %v630_v29  ;;  %579 = vmatpush1.bf16.msra.mxu1 %v630_v29 }
  0x4a   :  { %335 = vmatprep.subr.bf16.mxu0 %v631_v30  ;;  %564 = vmatprep.subr.bf16.mxu1 %v631_v30 }
  0x4d   :  { %336 = vmatpush1.bf16.msra.mxu0 %v633_v31  ;;  %580 = vmatpush1.bf16.msra.mxu1 %v633_v31 }
  0x4e   :  { %337 = vmatprep.subr.bf16.mxu0 %v634_v32  ;;  %565 = vmatprep.subr.bf16.mxu1 %v634_v32 }
  0x51   :  { %338 = vmatpush1.bf16.msra.mxu0 %v636_v33  ;;  %581 = vmatpush1.bf16.msra.mxu1 %v636_v33 }
  0x54   :  { %340 = vmatmul.mubr.bf16.vlgmr.msra.gmra.mrb[0].mxu0 %v637_v34  ;;  %360 = vmatmul.mubr.bf16.vlgmr.msra.gmra.mrb[0].mxu1 %v640_v35 }
  0x55   :  { %349 = vmatprep.mubr.bf16.mxu0 %v643_v36  ;;  %369 = vmatprep.mubr.bf16.mxu1 %v645_v37 }
  0x5c   :  { %350 = vmatmul.mubr.bf16.gmra.mrb[4].mxu0 %v647_v38  ;;  %370 = vmatmul.mubr.bf16.gmra.mrb[4].mxu1 %v648_v39 }
 0x127   :  { %v341_v46 = vpop.f32.mrb[0].mxu0  ;;  %v361_v47 = vpop.f32.mrb[0].mxu1 }
 0x128   :  { %v343_v49 = vpop.f32.mrb[1].mxu0  ;;  %v363_v50 = vpop.f32.mrb[1].mxu1  ;;  %v443_v54 = vadd.f32 %v436_v45, %v341_v46  ;;  %v451_v55 = vadd.f32 %v436_v45, %v361_v47 }
 0x129   :  { %v345_v52 = vpop.f32.mrb[2].mxu0  ;;  %v365_v53 = vpop.f32.mrb[2].mxu1  ;;  %v444_v58 = vadd.f32 %v440_v48, %v343_v49  ;;  %v452_v59 = vadd.f32 %v440_v48, %v363_v50 }
 0x12a   :  { %v347_v56 = vpop.f32.mrb[3].mxu0  ;;  %v367_v57 = vpop.f32.mrb[3].mxu1  ;;  %v461_v60 = vmul.f32 %v460_v51, %v443_v54  ;;  %v469_v61 = vmul.f32 %v460_v51, %v451_v55  ;;  %v445_v62 = vadd.f32 %v436_v45, %v345_v52  ;;  %v453_v63 = vadd.f32 %v436_v45, %v365_v53 }
 0x12b   :  { %v462_v0 = vmul.f32 %v460_v51, %v444_v58  ;;  %v470_v1 = vmul.f32 %v460_v51, %v452_v59  ;;  %v446_v2 = vadd.f32 %v440_v48, %v347_v56  ;;  %v454_v3 = vadd.f32 %v440_v48, %v367_v57 }
 0x12c   :  { %477 = vst [vmem:[#allocation7] sm:$0xff] %v461_v60  ;;  %485 = vst [vmem:[#allocation7 + $0x40] sm:$0xff] %v469_v61  ;;  %v463_v4 = vmul.f32 %v460_v51, %v445_v62  ;;  %v471_v5 = vmul.f32 %v460_v51, %v453_v63 }
 0x12d   :  { %478 = vst [vmem:[#allocation7 + $0x8] sm:$0xff] %v462_v0  ;;  %486 = vst [vmem:[#allocation7 + $0x48] sm:$0xff] %v470_v1  ;;  %v464_v6 = vmul.f32 %v460_v51, %v446_v2  ;;  %v472_v7 = vmul.f32 %v460_v51, %v454_v3 }
 0x12e   :  { %479 = vst [vmem:[#allocation7 + $0x10] sm:$0xff] %v463_v4  ;;  %487 = vst [vmem:[#allocation7 + $0x50] sm:$0xff] %v471_v5 }
 0x12f   :  { %v351_v8 = vpop.f32.mrb[4].mxu0  ;;  %v371_v9 = vpop.f32.mrb[4].mxu1  ;;  %480 = vst [vmem:[#allocation7 + $0x18] sm:$0xff] %v464_v6  ;;  %488 = vst [vmem:[#allocation7 + $0x58] sm:$0xff] %v472_v7 }
 0x130   :  { %v353_v10 = vpop.f32.mrb[5].mxu0  ;;  %v373_v11 = vpop.f32.mrb[5].mxu1  ;;  %v447_v14 = vadd.f32 %v436_v45, %v351_v8  ;;  %v455_v15 = vadd.f32 %v436_v45, %v371_v9 }
 0x131   :  { %v355_v12 = vpop.f32.mrb[6].mxu0  ;;  %v375_v13 = vpop.f32.mrb[6].mxu1  ;;  %v448_v18 = vadd.f32 %v440_v48, %v353_v10  ;;  %v456_v19 = vadd.f32 %v440_v48, %v373_v11 }
 0x132   :  { %v357_v16 = vpop.f32.mrb[7].mxu0  ;;  %v377_v17 = vpop.f32.mrb[7].mxu1  ;;  %v465_v20 = vmul.f32 %v460_v51, %v447_v14  ;;  %v473_v21 = vmul.f32 %v460_v51, %v455_v15  ;;  %v449_v22 = vadd.f32 %v436_v45, %v355_v12  ;;  %v457_v23 = vadd.f32 %v436_v45, %v375_v13 }
 0x133   :  { %v466_v24 = vmul.f32 %v460_v51, %v448_v18  ;;  %v474_v25 = vmul.f32 %v460_v51, %v456_v19  ;;  %v450_v26 = vadd.f32 %v440_v48, %v357_v16  ;;  %v458_v27 = vadd.f32 %v440_v48, %v377_v17 }
 0x134   :  { %481 = vst [vmem:[#allocation7 + $0x20] sm:$0xff] %v465_v20  ;;  %489 = vst [vmem:[#allocation7 + $0x60] sm:$0xff] %v473_v21  ;;  %v467_v28 = vmul.f32 %v460_v51, %v449_v22  ;;  %v475_v29 = vmul.f32 %v460_v51, %v457_v23 }
 0x135   :  { %482 = vst [vmem:[#allocation7 + $0x28] sm:$0xff] %v466_v24  ;;  %490 = vst [vmem:[#allocation7 + $0x68] sm:$0xff] %v474_v25  ;;  %v468_v30 = vmul.f32 %v460_v51, %v450_v26  ;;  %v476_v31 = vmul.f32 %v460_v51, %v458_v27 }
 0x136   :  { %483 = vst [vmem:[#allocation7 + $0x30] sm:$0xff] %v467_v28  ;;  %491 = vst [vmem:[#allocation7 + $0x70] sm:$0xff] %v475_v29 }
 0x137   :  { %484 = vst [vmem:[#allocation7 + $0x38] sm:$0xff] %v468_v30  ;;  %492 = vst [vmem:[#allocation7 + $0x78] sm:$0xff] %v476_v31 }
 0x138   :  { %682 = shalt.err (!%p679_p12)
}
 0x139   :  { %s683_s24 = scalar_lea.hbm %s786_s4, 2048 }
 0x13a   :  { %p684_p13 = scmp.ne.s32.totalorder %s786_s4, %s683_s24  ;;  %p687_p0 = scmp.lt.u32.totalorder %s683_s24, %s786_s4 }
 0x13c   :  { %p689_p1 = pnand %p687_p0, %p684_p13 }
 0x13e   :  { %692 = shalt.err (!%p689_p1)
}
 0x13f   :  { %s701_s2 = smov 256   ;;  %s702_s29 = smov 16  }
 0x140   :  { %504 = dma.vmem_to_hbm [thread:$0]  %s499_s1, 2048, %s786_s4, [#allocation6], %s701_s2, %s701_s2, %s702_s29  }
 0x141   :  { %695 = dma.done.wait [#allocation6], 2048  }
 0x142   :  { %696 = vsyncadd [#allocation6], 4294965248 }
 0x143   :  { %508 = vsyncpa [#allocation5], 1 }
 0x144   :  { %509 = vsyncpa [#allocation6], 1 }

</bundles_post_ra>
